<compile_context>
chip_gen: v7x
topology: tpu7x:2x2x1
jax: 0.10.0
libtpu: 0.0.40
codegen_flags: <defaults>
</compile_context>

<pallas_src>
import jax
import jax.numpy as jnp
from jax import lax
from jax.experimental import pallas as pl
from jax.experimental.pallas import tpu as pltpu

# ---- small, module-consistent sizes -----------------------------------------
B, S = 2, 8          # batch, sequence
Z = 32               # z_dim
E = 128              # embed_dim
V = 256              # vocab size (core_module.wte rows)
N_TYPES = 2
PAD_ID = 0           # TODO(synk): no padding_idx masking applied; matches only
                     # because GPT-style wte has no zeroed pad row semantics.


# =============================================================================
# Single fused kernel:
#   extra  = [latent | logvar] @ W_inj                         (folded head)
#   hidden = onehot(ids) @ wte + (wpe + c)[pos] + tte[type] + extra[batch]
#   logits = hidden @ wte.T                                    (tied lm_head)
# =============================================================================
def decoder_kernel(ids_ref, tids_ref, lz_ref, winj_ref, wte_ref, wpec_ref,
                   tte_ref, o_ref):
    n_tok, v = o_ref.shape
    seq, e = wpec_ref.shape
    n_b = lz_ref.shape[0]

    # Folded latent-injection head: [B, 2Z] @ [2Z, E] -> (B, E)
    extra = jnp.dot(lz_ref[...], winj_ref[...],
                    preferred_element_type=jnp.float32)

    # Token embedding gather as a one-hot MXU matmul (no scalar loop).
    ids = ids_ref[...]                                          # (B*S, 1) i32
    onehot = (lax.broadcasted_iota(jnp.int32, (n_tok, v), 1) == ids
              ).astype(jnp.float32)                             # (B*S, V)
    tok = jnp.dot(onehot, wte_ref[...],
                  preferred_element_type=jnp.float32)           # (B*S, E)

    # Positional table (conv bias already folded in), tiled over batch.
    pos = jnp.concatenate([wpec_ref[...]] * n_b, axis=0)        # (B*S, E)

    # Token-type embedding: N_TYPES == 2 -> vectorized select.
    tids = tids_ref[...]                                        # (B*S, 1) i32
    typ = jnp.where(tids == 0,
                    jnp.broadcast_to(tte_ref[0:1, :], (n_tok, e)),
                    jnp.broadcast_to(tte_ref[1:2, :], (n_tok, e)))

    # Injected extra embedding: each batch row repeated over its seq rows.
    extra_rows = jnp.concatenate(
        [jnp.broadcast_to(extra[b:b + 1, :], (seq, e)) for b in range(n_b)],
        axis=0)                                                 # (B*S, E)

    hidden = tok + pos + typ + extra_rows                       # (B*S, E)

    # Tied lm_head: logits = hidden @ wte.T (NT contraction on E; same
    # VMEM-resident wte used by the gather, no transpose materialized).
    o_ref[...] = lax.dot_general(
        hidden, wte_ref[...],
        dimension_numbers=(((1,), (1,)), ((), ())),
        preferred_element_type=jnp.float32).astype(o_ref.dtype)


# =============================================================================
# One-time parameter preprocessing (algebraic fold of the inject head).
#   conv(2->3, k=1) + flatten + Comb1 is linear =>
#     A  = sum_i conv_w[i,0] * Wc_i.T,  Bm = sum_i conv_w[i,1] * Wc_i.T
#     c  = sum_i conv_b[i]   * rowsum(Wc_i.T)
#     W_inj = [[W_var.T @ A], [W_ls.T @ Bm]]   (shape [2Z, E])
#   c is constant over batch & position, so it rides on the positional table.
# =============================================================================
def prepare_params(p):
    e = p["w_comb"].shape[0]
    wcT = p["w_comb"].T                                      # [3E, E]
    blocks = [wcT[i * e:(i + 1) * e] for i in range(3)]      # Wc_i.T, each [E,E]
    A = sum(p["conv_w"][i, 0] * blocks[i] for i in range(3))
    Bm = sum(p["conv_w"][i, 1] * blocks[i] for i in range(3))
    cvec = sum(p["conv_b"][i] * blocks[i].sum(axis=0) for i in range(3))
    w_inj = jnp.concatenate([p["w_var"].T @ A, p["w_ls"].T @ Bm], axis=0)  # [2Z,E]
    return {"w_inj": w_inj,
            "wpe_c": p["wpe"] + cvec[None, :],               # wpe + folded bias
            "wte": p["wte"], "tte": p["tte"]}


# =============================================================================
# Forward pass of UACVAEConvDecoder (inject_type == 'embedding')
# TODO(synk): core_module's transformer blocks are external; the stand-in
# hidden state here is the GPT-style embedding sum (wte + wpe + token_type)
# with the extra embedding injected additively, which is what the 'embedding'
# inject path feeds the core.
# =============================================================================
def forward(pp, input_ids, type_ids, latent_sample, logvar):
    b, s = input_ids.shape
    v, e = pp["wte"].shape
    n_tok = b * s
    lz = jnp.concatenate([latent_sample, logvar], axis=1)     # [B, 2Z]
    ids = input_ids.reshape(n_tok, 1).astype(jnp.int32)       # [B*S, 1] -> VMEM
    tids = type_ids.reshape(n_tok, 1).astype(jnp.int32)       # [B*S, 1] -> VMEM

    vmem = pl.BlockSpec(memory_space=pltpu.MemorySpace.VMEM)

    # onehot gather matmul + lm_head matmul dominate the flop count.
    flops = 2 * n_tok * v * e + 2 * n_tok * e * v + 2 * b * lz.shape[1] * e
    bytes_accessed = 4 * (v * e + s * e + N_TYPES * e + lz.size
                          + pp["w_inj"].size + n_tok * v) + 2 * 4 * n_tok

    logits = pl.pallas_call(
        decoder_kernel,
        out_shape=jax.ShapeDtypeStruct((n_tok, v), jnp.float32),
        in_specs=[vmem] * 7,
        out_specs=vmem,
        cost_estimate=pl.CostEstimate(flops=flops, transcendentals=0,
                                      bytes_accessed=bytes_accessed),
    )(ids, tids, lz, pp["w_inj"], pp["wte"], pp["wpe_c"], pp["tte"])
    return logits.reshape(b, s, v)


# Pure-JAX reference (unfolded, matches the PyTorch module) for correctness.
def reference(params, input_ids, type_ids, latent, logvar):
    ls = latent @ params["w_var"].T
    var = logvar @ params["w_ls"].T
    stacked = jnp.stack([ls, var], axis=1)                               # [B,2,E]
    conv = (jnp.einsum("oc,bce->boe", params["conv_w"], stacked)
            + params["conv_b"][None, :, None])                           # [B,3,E]
    extra = conv.reshape(conv.shape[0], -1) @ params["w_comb"].T         # [B,E]
    tok = params["wte"][input_ids]
    pos = params["wpe"][jnp.arange(input_ids.shape[1])][None]
    typ = params["tte"][type_ids]
    hidden = tok + pos + typ + extra[:, None, :]
    return hidden @ params["wte"].T


if __name__ == "__main__":
    key = jax.random.PRNGKey(0)
    ks = jax.random.split(key, 12)
    params = {
        "wte":    0.02 * jax.random.normal(ks[0], (V, E), jnp.float32),  # tied lm_head weight
        "wpe":    0.02 * jax.random.normal(ks[1], (S, E), jnp.float32),
        "tte":    0.02 * jax.random.normal(ks[2], (N_TYPES, E), jnp.float32),
        "w_var":  0.05 * jax.random.normal(ks[3], (E, Z), jnp.float32),  # latent_head_var
        "w_ls":   0.05 * jax.random.normal(ks[4], (E, Z), jnp.float32),  # latent_head_LS
        "conv_w": 0.30 * jax.random.normal(ks[5], (3, 2), jnp.float32),  # Conv1d(2,3,1) weight
        "conv_b": 0.10 * jax.random.normal(ks[6], (3,), jnp.float32),    # Conv1d bias
        "w_comb": 0.05 * jax.random.normal(ks[7], (E, 3 * E), jnp.float32),  # latent_head_Comb1
    }
    input_ids = jax.random.randint(ks[8], (B, S), 0, V)
    type_ids = jax.random.randint(ks[9], (B, S), 0, N_TYPES)
    latent_sample = jax.random.normal(ks[10], (B, Z), jnp.float32)
    logvar = jax.random.normal(ks[11], (B, Z), jnp.float32)

    prepped = prepare_params(params)                 # one-time weight folding
    logits = forward(prepped, input_ids, type_ids, latent_sample, logvar)
    jax.block_until_ready(logits)

    ref = reference(params, input_ids, type_ids, latent_sample, logvar)
    assert logits.shape == (B, S, V)
    assert jnp.allclose(logits, ref, rtol=1e-3, atol=1e-3)
    print("KERNEL_OK")
</pallas_src>

<mosaic_0001>
module attributes {stable_mosaic.version = 11 : i64} {
  func.func @decoder_kernel(%arg0: memref<16x1xi32, #tpu.memory_space<vmem>>, %arg1: memref<16x1xi32, #tpu.memory_space<vmem>>, %arg2: memref<2x64xf32, #tpu.memory_space<vmem>>, %arg3: memref<64x128xf32, #tpu.memory_space<vmem>>, %arg4: memref<256x128xf32, #tpu.memory_space<vmem>>, %arg5: memref<8x128xf32, #tpu.memory_space<vmem>>, %arg6: memref<2x128xf32, #tpu.memory_space<vmem>>, %arg7: memref<16x256xf32, #tpu.memory_space<vmem>>) attributes {dimension_semantics = [], scalar_prefetch = 0 : i64, scratch_operands = 0 : i64, tpu.core_type = #tpu.core_type<tc>} {
    %c0 = arith.constant 0 : index
    %c0_0 = arith.constant 0 : index
    %0 = vector.load %arg2[%c0, %c0_0] : memref<2x64xf32, #tpu.memory_space<vmem>>, vector<2x64xf32>
    %c0_1 = arith.constant 0 : index
    %c0_2 = arith.constant 0 : index
    %1 = vector.load %arg3[%c0_1, %c0_2] : memref<64x128xf32, #tpu.memory_space<vmem>>, vector<64x128xf32>
    %cst = arith.constant dense<0.000000e+00> : vector<2x128xf32>
    %2 = tpu.matmul %0, %1, %cst {dimension_numbers = #tpu.dot_dimension_numbers<[1], [0], [0], [1], [0, 0, 1, 1], [], []>} : vector<2x64xf32>, vector<64x128xf32>, vector<2x128xf32> -> vector<2x128xf32>
    %c0_3 = arith.constant 0 : index
    %c0_4 = arith.constant 0 : index
    %3 = vector.load %arg0[%c0_3, %c0_4] : memref<16x1xi32, #tpu.memory_space<vmem>>, vector<16x1xi32>
    %4 = tpu.iota {dimensions = array<i32: 1>} : vector<16x256xi32>
    %5 = vector.broadcast %3 : vector<16x1xi32> to vector<16x256xi32>
    %6 = arith.cmpi eq, %4, %5 : vector<16x256xi32>
    %7 = arith.extui %6 : vector<16x256xi1> to vector<16x256xi32>
    %8 = arith.sitofp %7 : vector<16x256xi32> to vector<16x256xf32>
    %c0_5 = arith.constant 0 : index
    %c0_6 = arith.constant 0 : index
    %9 = vector.load %arg4[%c0_5, %c0_6] : memref<256x128xf32, #tpu.memory_space<vmem>>, vector<256x128xf32>
    %cst_7 = arith.constant dense<0.000000e+00> : vector<16x128xf32>
    %10 = tpu.matmul %8, %9, %cst_7 {dimension_numbers = #tpu.dot_dimension_numbers<[1], [0], [0], [1], [0, 0, 1, 1], [], []>} : vector<16x256xf32>, vector<256x128xf32>, vector<16x128xf32> -> vector<16x128xf32>
    %c0_8 = arith.constant 0 : index
    %c0_9 = arith.constant 0 : index
    %11 = vector.load %arg5[%c0_8, %c0_9] : memref<8x128xf32, #tpu.memory_space<vmem>>, vector<8x128xf32>
    %12 = tpu.concatenate %11, %11 in 0 : vector<8x128xf32>, vector<8x128xf32> -> vector<16x128xf32>
    %c0_10 = arith.constant 0 : index
    %c0_11 = arith.constant 0 : index
    %13 = vector.load %arg1[%c0_10, %c0_11] : memref<16x1xi32, #tpu.memory_space<vmem>>, vector<16x1xi32>
    %c0_i32 = arith.constant 0 : i32
    %14 = vector.broadcast %c0_i32 : i32 to vector<16x1xi32>
    %15 = arith.cmpi eq, %13, %14 : vector<16x1xi32>
    %c0_12 = arith.constant 0 : index
    %c0_13 = arith.constant 0 : index
    %16 = vector.load %arg6[%c0_12, %c0_13] : memref<2x128xf32, #tpu.memory_space<vmem>>, vector<1x128xf32>
    %17 = vector.shape_cast %16 : vector<1x128xf32> to vector<1x128xf32>
    %18 = vector.broadcast %17 : vector<1x128xf32> to vector<16x128xf32>
    %c1 = arith.constant 1 : index
    %c0_14 = arith.constant 0 : index
    %19 = vector.load %arg6[%c1, %c0_14] : memref<2x128xf32, #tpu.memory_space<vmem>>, vector<1x128xf32>
    %20 = vector.shape_cast %19 : vector<1x128xf32> to vector<1x128xf32>
    %21 = vector.broadcast %20 : vector<1x128xf32> to vector<16x128xf32>
    %22 = vector.shape_cast %15 : vector<16x1xi1> to vector<16x1xi1>
    %23 = vector.broadcast %22 : vector<16x1xi1> to vector<16x128xi1>
    %24 = arith.select %23, %18, %21 : vector<16x128xi1>, vector<16x128xf32>
    %25 = vector.extract_strided_slice %2 {offsets = [0, 0], sizes = [1, 128], strides = [1, 1]} : vector<2x128xf32> to vector<1x128xf32>
    %26 = vector.shape_cast %25 : vector<1x128xf32> to vector<1x128xf32>
    %27 = vector.broadcast %26 : vector<1x128xf32> to vector<8x128xf32>
    %28 = vector.extract_strided_slice %2 {offsets = [1, 0], sizes = [1, 128], strides = [1, 1]} : vector<2x128xf32> to vector<1x128xf32>
    %29 = vector.shape_cast %28 : vector<1x128xf32> to vector<1x128xf32>
    %30 = vector.broadcast %29 : vector<1x128xf32> to vector<8x128xf32>
    %31 = tpu.concatenate %27, %30 in 0 : vector<8x128xf32>, vector<8x128xf32> -> vector<16x128xf32>
    %32 = arith.addf %10, %12 : vector<16x128xf32>
    %33 = arith.addf %32, %24 : vector<16x128xf32>
    %34 = arith.addf %33, %31 : vector<16x128xf32>
    %c0_15 = arith.constant 0 : index
    %c0_16 = arith.constant 0 : index
    %35 = vector.load %arg4[%c0_15, %c0_16] : memref<256x128xf32, #tpu.memory_space<vmem>>, vector<256x128xf32>
    %cst_17 = arith.constant dense<0.000000e+00> : vector<16x256xf32>
    %36 = tpu.matmul %34, %35, %cst_17 {dimension_numbers = #tpu.dot_dimension_numbers<[1], [1], [0], [0], [0, 0, 1, 0], [], []>} : vector<16x128xf32>, vector<256x128xf32>, vector<16x256xf32> -> vector<16x256xf32>
    %c0_18 = arith.constant 0 : index
    %c0_19 = arith.constant 0 : index
    %37 = vector.load %arg7[%c0_18, %c0_19] : memref<16x256xf32, #tpu.memory_space<vmem>>, vector<16x256xf32>
    tpu.vector_store %arg7[%c0_18, %c0_19], %36 {strides = array<i32>} : memref<16x256xf32, #tpu.memory_space<vmem>>, vector<16x256xf32>,
    return
  }
}

</mosaic_0001>

<bundles_post_ra>
// kernel: tpu_custom_call.1
= control target key start
LH: loop header
LB: loop body
LE: loop exit
PB: predicated region body
PF: predicated region fallthrough
CT: control target
= control target key end

     0   :  { %12 = vsyncpa [#allocation3], 0  ;;  %s793_s0 = inlined_call_operand.vmem [shape: s32[16,1], index: 0, kind: input, shape index: {}]   ;;  %s794_s1 = inlined_call_operand.vmem [shape: s32[16,1], index: 1, kind: input, shape index: {}]   ;;  %s795_s2 = inlined_call_operand.vmem [shape: f32[2,64], index: 2, kind: input, shape index: {}]   ;;  %s796_s3 = inlined_call_operand.hbm [shape: f32[64,128], index: 3, kind: input, shape index: {}]   ;;  %s797_s4 = inlined_call_operand.hbm [shape: f32[256,128], index: 4, kind: input, shape index: {}]   ;;  %s798_s5 = inlined_call_operand.vmem [shape: f32[8,128], index: 5, kind: input, shape index: {}]   ;;  %s799_s6 = inlined_call_operand.vmem [shape: f32[2,128], index: 6, kind: input, shape index: {}]   ;;  %s800_s7 = inlined_call_operand.hbm [shape: f32[16,256], index: 7, kind: output, shape index: {}]  }
   0x1   :  { %13 = vsyncpa [#allocation6], 0 }
   0x2   :  { %14 = vsyncpa [#allocation4], 0  ;;  %s681_s24 = smov [#allocation2]   ;;  %s609_s28 = scalar_lea.hbm %s796_s3, 1024 }
   0x3   :  { %s26_s25 = sshll.u32 %s681_s24, 4  ;;  %p610_p0 = scmp.ne.s32.totalorder %s796_s3, %s609_s28  ;;  %s27_s25 = int_to_ptr.vmem [resolvable:$true] %s26_s25 }
   0x4   :  { %p613_p1 = scmp.lt.u32.totalorder %s609_s28, %s796_s3 }
   0x6   :  { %p615_p2 = pnand %p613_p1, %p610_p0 }
   0x8   :  { %618 = shalt.err (!%p615_p2)
}
   0x9   :  { %s619_s10 = scalar_lea.vmem %s27_s25, 1024  ;;  %p624_p4 = scmp.lt.s32.totalorder %s27_s25, %s27_s25 }
   0xa   :  { %p620_p3 = scmp.ne.s32.totalorder %s27_s25, %s619_s10  ;;  %p625_p5 = scmp.lt.s32.totalorder %s619_s10, %s619_s10 }
   0xc   :  { %p626_p6 = por %p625_p5, %p624_p4 }
   0xe   :  { %p627_p7 = pnand %p626_p6, %p620_p3 }
  0x10   :  { %630 = shalt.err (!%p627_p7)
}
  0x11   :  { %s682_s11 = smov 128   ;;  %s683_s12 = smov 8  }
  0x12   :  { %32 = dma.hbm_to_vmem [thread:$0]  %s796_s3, 1024, %s27_s25, [#allocation3], %s682_s11, %s682_s11, %s683_s12  }
  0x13   :  { %s684_s15 = smov [#allocation5]   ;;  %s631_s19 = scalar_lea.hbm %s797_s4, 4096 }
  0x14   :  { %s38_s16 = sshll.u32 %s684_s15, 4  ;;  %p632_p8 = scmp.ne.s32.totalorder %s797_s4, %s631_s19  ;;  %s39_s16 = int_to_ptr.vmem [resolvable:$true] %s38_s16 }
  0x15   :  { %p635_p9 = scmp.lt.u32.totalorder %s631_s19, %s797_s4 }
  0x17   :  { %p637_p10 = pnand %p635_p9, %p632_p8 }
  0x19   :  { %640 = shalt.err (!%p637_p10)
}
  0x1a   :  { %s641_s24 = scalar_lea.vmem %s39_s16, 4096  ;;  %p646_p12 = scmp.lt.s32.totalorder %s39_s16, %s39_s16 }
  0x1b   :  { %p642_p11 = scmp.ne.s32.totalorder %s39_s16, %s641_s24  ;;  %p647_p13 = scmp.lt.s32.totalorder %s641_s24, %s641_s24 }
  0x1d   :  { %p648_p0 = por %p647_p13, %p646_p12 }
  0x1f   :  { %p649_p1 = pnand %p648_p0, %p642_p11 }
  0x21   :  { %652 = shalt.err (!%p649_p1)
}
  0x22   :  { %44 = dma.hbm_to_vmem [thread:$0]  %s797_s4, 4096, %s39_s16, [#allocation6], %s682_s11, %s682_s11, %s683_s12  }
  0x23   :  { %675 = dma.done.wait [#allocation3], 1024  }
  0x24   :  { %676 = vsyncadd [#allocation3], 4294966272 }
  0x25   :  { %677 = dma.done.wait [#allocation6], 4096  }
  0x26   :  { %678 = vsyncadd [#allocation6], 4294963200  ;;  %v685_v0 = vmov 0   ;;  %v686_v1 = vmov 0.0|0.0   ;;  %vm687_vm0 = vmmov 0   ;;  %v688_v2 = vmov 0.0  }
  0x27   :  { %607 = vset.pattern.permute.xlu0 %v685_v0  ;;  %519 = vmatprep.subr.bf16.mxu1 %v686_v1  ;;  %v138_v3 = vld [vmem:[%s793_s0] sm:$0xff]  ;;  %v56_v4 = vld [vmem:[#allocation2] sm:$0xff]  ;;  %v57_v5 = vld [vmem:[#allocation2 + $0x8] sm:$0xff]  ;;  %vm64_vm3 = vcmask 523264  }
  0x28   :  { %516 = vmatprep.mubr.msk.f32.mxu1 %vm687_vm0, %v688_v2  ;;  %608 = vset.pattern.permute.xlu1 %v685_v0  ;;  %v58_v6 = vld [vmem:[#allocation2 + $0x10] sm:$0xff]  ;;  %v59_v7 = vld [vmem:[#allocation2 + $0x18] sm:$0xff]  ;;  %v520_v9 = vpack.c.bf16 %v57_v5, %v56_v4  ;;  %v60_v10 = vld [vmem:[#allocation2 + $0x20] sm:$0xff] }
  0x29   :  { %144 = vperm.xlu0 %607, %v138_v3   ;;  %v139_v8 = vld [vmem:[%s793_s0 + $0x8] sm:$0xff]  ;;  %v177_v11 = vld [vmem:[#allocation5 + $0x80] sm:$0xff]  ;;  %v523_v12 = vpack.c.bf16 %v59_v7, %v58_v6  ;;  %v178_v13 = vld [vmem:[#allocation5 + $0x88] sm:$0xff]  ;;  %v140_v6 = vlaneseq }
  0x2a   :  { %521 = vmatpush3.bf16.msra.mxu1 %v520_v9  ;;  %v161_v14 = vld [vmem:[#allocation5] sm:$0xff]  ;;  %v162_v15 = vld [vmem:[#allocation5 + $0x8] sm:$0xff]  ;;  %v531_v17 = vpack.c.bf16 %v178_v13, %v177_v11  ;;  %v179_v18 = vld [vmem:[#allocation5 + $0x90] sm:$0xff] }
  0x2b   :  { %522 = vmatprep.subr.bf16.mxu1 %v686_v1  ;;  %v61_v16 = vld [vmem:[#allocation2 + $0x28] sm:$0xff]  ;;  %v180_v19 = vld [vmem:[#allocation5 + $0x98] sm:$0xff]  ;;  %v533_v20 = vpack.c.bf16 %v162_v15, %v161_v14  ;;  %v62_v23 = vld [vmem:[#allocation2 + $0x30] sm:$0xff]  ;;  %v141_v7 = vand.u32 127, %v140_v6  ;;  %v221_v15 = vshrl.u32 %v140_v6, 7 }
  0x2c   :  { %v535_v21 = vpack.c.bf16 %v180_v19, %v179_v18  ;;  %564 = vmatprep.subr.bf16.mxu0 %v531_v17  ;;  %v526_v22 = vpack.c.bf16 %v61_v16, %v60_v10  ;;  %v63_v24 = vld [vmem:[#allocation2 + $0x38] sm:$0xff]  ;;  %v163_v25 = vld [vmem:[#allocation5 + $0x10] sm:$0xff]  ;;  %v181_v28 = vld [vmem:[#allocation5 + $0xa0] sm:$0xff]  ;;  %v689_v10 = vmov 1.0  }
  0x2d   :  { %147 = vperm.xlu0 %607, %v139_v8   ;;  %566 = vmatpush3.bf16.xpose.msra.mxu0 %v533_v20  ;;  %v164_v26 = vld [vmem:[#allocation5 + $0x18] sm:$0xff]  ;;  %v529_v27 = vpack.c.bf16 %v63_v24, %v62_v23  ;;  %v182_v29 = vld [vmem:[#allocation5 + $0xa8] sm:$0xff]  ;;  %v194_v31 = vld [vmem:[%s794_s1] sm:$0xff]  ;;  %v142_v8 = vadd.s32 128, %v141_v7 }
  0x2e   :  { %524 = vmatpush3.bf16.msra.mxu1 %v523_v12  ;;  %568 = vmatprep.subr.bf16.mxu0 %v535_v21  ;;  %v537_v30 = vpack.c.bf16 %v164_v26, %v163_v25  ;;  %v195_v32 = vld [vmem:[%s794_s1 + $0x8] sm:$0xff]  ;;  %vm196_vm1 = vcmp.eq.s32.totalorder %v194_v31, 0  ;;  %v55_v33 = vld [vmem:[%s795_s2] sm:$0x3]  ;;  %v539_v34 = vpack.c.bf16 %v182_v29, %v181_v28  ;;  %v165_v37 = vld [vmem:[#allocation5 + $0x20] sm:$0xff] }
  0x2f   :  { %525 = vmatprep.subr.bf16.mxu1 %v686_v1  ;;  %vm197_vm2 = vcmp.eq.s32.totalorder %v195_v32, 0  ;;  %v208_v35 = vsel %vm196_vm1, 1, %v685_v0  ;;  %v166_v38 = vld [vmem:[#allocation5 + $0x28] sm:$0xff]  ;;  %v183_v39 = vld [vmem:[#allocation5 + $0xb0] sm:$0xff]  ;;  %v184_v40 = vld [vmem:[#allocation5 + $0xb8] sm:$0xff] }
  0x30   :  { %211 = vperm.xlu1 %608, %v208_v35   ;;  %v209_v36 = vsel %vm197_vm2, 1, %v685_v0  ;;  %v541_v41 = vpack.c.bf16 %v166_v38, %v165_v37  ;;  %v543_v42 = vpack.c.bf16 %v184_v40, %v183_v39  ;;  %v167_v43 = vld [vmem:[#allocation5 + $0x30] sm:$0xff]  ;;  %v168_v44 = vld [vmem:[#allocation5 + $0x38] sm:$0xff]  ;;  %v185_v45 = vld [vmem:[#allocation5 + $0xc0] sm:$0xff] }
  0x31   :  { %v186_v46 = vld [vmem:[#allocation5 + $0xc8] sm:$0xff]  ;;  %v545_v47 = vpack.c.bf16 %v168_v44, %v167_v43  ;;  %v169_v49 = vld [vmem:[#allocation5 + $0x40] sm:$0xff]  ;;  %v187_v51 = vld [vmem:[#allocation5 + $0xd0] sm:$0xff] }
  0x32   :  { %527 = vmatpush3.bf16.msra.mxu1 %v526_v22  ;;  %v547_v48 = vpack.c.bf16 %v186_v46, %v185_v45  ;;  %v170_v50 = vld [vmem:[#allocation5 + $0x48] sm:$0xff]  ;;  %v188_v52 = vld [vmem:[#allocation5 + $0xd8] sm:$0xff]  ;;  %v171_v55 = vld [vmem:[#allocation5 + $0x50] sm:$0xff] }
  0x33   :  { %528 = vmatprep.subr.bf16.mxu1 %v686_v1  ;;  %v549_v53 = vpack.c.bf16 %v170_v50, %v169_v49  ;;  %v551_v54 = vpack.c.bf16 %v188_v52, %v187_v51  ;;  %v172_v56 = vld [vmem:[#allocation5 + $0x58] sm:$0xff]  ;;  %v189_v57 = vld [vmem:[#allocation5 + $0xe0] sm:$0xff]  ;;  %v190_v58 = vld [vmem:[#allocation5 + $0xe8] sm:$0xff] }
  0x34   :  { %214 = vperm.xlu1 %608, %v209_v36   ;;  %v553_v59 = vpack.c.bf16 %v172_v56, %v171_v55  ;;  %v555_v60 = vpack.c.bf16 %v190_v58, %v189_v57  ;;  %v173_v61 = vld [vmem:[#allocation5 + $0x60] sm:$0xff]  ;;  %v174_v62 = vld [vmem:[#allocation5 + $0x68] sm:$0xff]  ;;  %v191_v63 = vld [vmem:[#allocation5 + $0xf0] sm:$0xff] }
  0x35   :  { %570 = vmatpush3.bf16.xpose.msra.mxu0 %v537_v30  ;;  %v192_v0 = vld [vmem:[#allocation5 + $0xf8] sm:$0xff]  ;;  %v557_v1 = vpack.c.bf16 %v174_v62, %v173_v61  ;;  %v175_v3 = vld [vmem:[#allocation5 + $0x70] sm:$0xff] }
  0x36   :  { %530 = vmatpush3.bf16.msra.mxu1 %v529_v27  ;;  %572 = vmatprep.subr.bf16.mxu0 %v539_v34  ;;  %v559_v2 = vpack.c.bf16 %v192_v0, %v191_v63  ;;  %v176_v4 = vld [vmem:[#allocation5 + $0x78] sm:$0xff]  ;;  %v411_v16 = vld [vmem:[%s799_s6] ss:$0 sm:$0xff]  ;;  %v226_v27 = vsub.s32 1, %v221_v15 }
  0x37   :  { %532 = vmatprep.subr.bf16.mxu1 %v531_v17  ;;  %v561_v5 = vpack.c.bf16 %v176_v4, %v175_v3  ;;  %v412_v17 = vld [vmem:[%s799_s6 + $0x1] ss:$0 sm:$0xff] }
  0x38   :  { %v193_v19 = vld [vmem:[%s798_s5] sm:$0xff]  ;;  %s690_s5 = smov [#allocation7]  }
  0x39   :  { %517 = vmatmul.mubr.msk.f32.vlgmr.msra.gmra.mrb[0].mxu1 %vm64_vm3, %v55_v33  ;;  %s393_s6 = sshll.u32 %s690_s5, 4  ;;  %s394_s6 = int_to_ptr.vmem [resolvable:$true] %s393_s6 }
  0x3a   :  { %534 = vmatpush3.bf16.msra.mxu1 %v533_v20  ;;  %s653_s15 = scalar_lea.vmem %s394_s6, 512  ;;  %p658_p3 = scmp.lt.s32.totalorder %s394_s6, %s394_s6 }
  0x3b   :  { %536 = vmatprep.subr.bf16.mxu1 %v535_v21  ;;  %v222_v21 = vsub.s32 0, %v221_v15  ;;  %p654_p2 = scmp.ne.s32.totalorder %s394_s6, %s653_s15  ;;  %p659_p4 = scmp.lt.s32.totalorder %s653_s15, %s653_s15 }
  0x3d   :  { %574 = vmatpush3.bf16.xpose.msra.mxu0 %v541_v41  ;;  %p660_p5 = por %p659_p4, %p658_p3 }
  0x3e   :  { %538 = vmatpush3.bf16.msra.mxu1 %v537_v30  ;;  %576 = vmatprep.subr.bf16.mxu0 %v543_v42 }
  0x3f   :  { %540 = vmatprep.subr.bf16.mxu1 %v539_v34  ;;  %p661_p6 = pnand %p660_p5, %p654_p2 }
  0x42   :  { %542 = vmatpush3.bf16.msra.mxu1 %v541_v41 }
  0x43   :  { %544 = vmatprep.subr.bf16.mxu1 %v543_v42 }
  0x45   :  { %578 = vmatpush3.bf16.xpose.msra.mxu0 %v545_v47 }
  0x46   :  { %546 = vmatpush3.bf16.msra.mxu1 %v545_v47  ;;  %580 = vmatprep.subr.bf16.mxu0 %v547_v48 }
  0x47   :  { %548 = vmatprep.subr.bf16.mxu1 %v547_v48 }
  0x4a   :  { %550 = vmatpush3.bf16.msra.mxu1 %v549_v53 }
  0x4b   :  { %552 = vmatprep.subr.bf16.mxu1 %v551_v54 }
  0x4d   :  { %582 = vmatpush3.bf16.xpose.msra.mxu0 %v549_v53 }
  0x4e   :  { %554 = vmatpush3.bf16.msra.mxu1 %v553_v59  ;;  %584 = vmatprep.subr.bf16.mxu0 %v551_v54 }
  0x4f   :  { %556 = vmatprep.subr.bf16.mxu1 %v555_v60 }
  0x52   :  { %558 = vmatpush3.bf16.msra.mxu1 %v557_v1 }
  0x53   :  { %560 = vmatprep.subr.bf16.mxu1 %v559_v2 }
  0x55   :  { %586 = vmatpush3.bf16.xpose.msra.mxu0 %v553_v59 }
  0x56   :  { %562 = vmatpush3.bf16.msra.mxu1 %v561_v5  ;;  %588 = vmatprep.subr.bf16.mxu0 %v555_v60 }
  0x5d   :  { %590 = vmatpush3.bf16.xpose.msra.mxu0 %v557_v1 }
  0x5e   :  { %592 = vmatprep.subr.bf16.mxu0 %v559_v2 }
  0x65   :  { %594 = vmatpush3.bf16.xpose.msra.mxu0 %v561_v5 }
  0xa8   :  { %v145_v9 = vpop.permute.xlu0 %144 }
  0xa9   :  { %vm149_vm4 = vcmp.eq.s32.totalorder %v141_v7, %v145_v9  ;;  %vm150_vm5 = vcmp.eq.s32.totalorder %v142_v8, %v145_v9 }
  0xaa   :  { %413 = vmatprep.mubr.msk.f32.mxu1 %vm150_vm5, %v689_v10 }
  0xab   :  { %414 = vmatmul.mubr.msk.f32.vlgmr.msra.gmra.mrb[2].mxu1 %vm149_vm4, %v689_v10 }
  0xac   :  { %v148_v11 = vpop.permute.xlu0 %147 }
  0xad   :  { %vm151_vm6 = vcmp.eq.s32.totalorder %v141_v7, %v148_v11  ;;  %vm152_vm7 = vcmp.eq.s32.totalorder %v142_v8, %v148_v11 }
  0xae   :  { %415 = vmatprep.mubr.msk.f32.mxu1 %vm152_vm7, %v689_v10 }
  0xaf   :  { %416 = vmatmul.mubr.msk.f32.gmra.mrb[4].mxu1 %vm151_vm6, %v689_v10  ;;  %v212_v14 = vpop.permute.xlu1 %211 }
  0xb0   :  { %vm216_vm8 = vcmp.eq.s32.totalorder %v212_v14, 1 }
  0xb1   :  { %v218_v23 = vsel %vm216_vm8, %v411_v16, %v412_v17 }
  0xb3   :  { %v215_v24 = vpop.permute.xlu1 %214 }
  0xb4   :  { %vm217_vm9 = vcmp.eq.s32.totalorder %v215_v24, 1 }
  0xb5   :  { %v219_v34 = vsel %vm217_vm9, %v411_v16, %v412_v17 }
 0x10c   :  { %v134_v12 = vpop.f32.mrb[0].mxu1 }
 0x10d   :  { %v518_v13 = vpop.f32.mrb[1].mxu1  ;;  %v223_v29 = vrot.slane %v134_v12, %v222_v21  ;;  %v227_v35 = vrot.slane %v134_v12, %v226_v27 }
 0x17e   :  { %v458_v18 = vpop.f32.mrb[2].mxu1 }
 0x17f   :  { %v459_v20 = vpop.f32.mrb[3].mxu1 }
 0x180   :  { %v460_v22 = vadd.f32 %v459_v20, %v458_v18 }
 0x182   :  { %v295_v25 = vadd.f32 %v460_v22, %v193_v19  ;;  %v461_v26 = vpop.f32.mrb[4].mxu1 }
 0x183   :  { %v462_v28 = vpop.f32.mrb[5].mxu1 }
 0x184   :  { %v463_v30 = vadd.f32 %v462_v28, %v461_v26  ;;  %v303_v31 = vadd.f32 %v295_v25, %v218_v23 }
 0x186   :  { %v300_v32 = vadd.f32 %v463_v30, %v193_v19  ;;  %v305_v33 = vadd.f32 %v303_v31, %v223_v29 }
 0x188   :  { %v304_v36 = vadd.f32 %v300_v32, %v219_v34  ;;  %496 = vmatprep.mubr.f32.mxu0 %v305_v33 }
 0x189   :  { %497 = vmatmul.mubr.f32.vlgmr.msra.gmra.mrb[0].mxu0 %v305_v33 }
 0x18a   :  { %v306_v37 = vadd.f32 %v304_v36, %v227_v35 }
 0x18c   :  { %498 = vmatprep.mubr.f32.mxu0 %v306_v37 }
 0x18d   :  { %499 = vmatmul.mubr.f32.gmra.mrb[2].mxu0 %v306_v37 }
 0x25c   :  { %v373_v38 = vpop.f32.mrb[0].mxu0 }
 0x25d   :  { %384 = vst [vmem:[#allocation7] sm:$0xff] %v373_v38  ;;  %v375_v39 = vpop.f32.mrb[1].mxu0 }
 0x25e   :  { %385 = vst [vmem:[#allocation7 + $0x8] sm:$0xff] %v375_v39 }
 0x260   :  { %v379_v40 = vpop.f32.mrb[2].mxu0 }
 0x261   :  { %386 = vst [vmem:[#allocation7 + $0x10] sm:$0xff] %v379_v40  ;;  %v381_v41 = vpop.f32.mrb[3].mxu0 }
 0x262   :  { %387 = vst [vmem:[#allocation7 + $0x18] sm:$0xff] %v381_v41 }
 0x263   :  { %664 = shalt.err (!%p661_p6)
}
 0x264   :  { %s665_s18 = scalar_lea.hbm %s800_s7, 512 }
 0x265   :  { %p666_p7 = scmp.ne.s32.totalorder %s800_s7, %s665_s18  ;;  %p669_p8 = scmp.lt.u32.totalorder %s665_s18, %s800_s7 }
 0x267   :  { %p671_p9 = pnand %p669_p8, %p666_p7 }
 0x269   :  { %674 = shalt.err (!%p671_p9)
}
 0x26a   :  { %s691_s23 = smov 256   ;;  %s692_s24 = smov 16  }
 0x26b   :  { %399 = dma.vmem_to_hbm [thread:$0]  %s394_s6, 512, %s800_s7, [#allocation4], %s691_s23, %s691_s23, %s692_s24  }
 0x26c   :  { %679 = dma.done.wait [#allocation4], 512  }
 0x26d   :  { %680 = vsyncadd [#allocation4], 4294966784 }
 0x26e   :  { %403 = vsyncpa [#allocation3], 1 }
 0x26f   :  { %404 = vsyncpa [#allocation6], 1 }
 0x270   :  { %405 = vsyncpa [#allocation4], 1 }

</bundles_post_ra>
